<compile_context>
chip_gen: v6e
topology: v6e:2x2x1
jax: 0.10.0
libtpu: 0.0.40
codegen_flags: <defaults>
</compile_context>

<pallas_src>
import math

import jax
import jax.numpy as jnp
from jax.experimental import pallas as pl
from jax.experimental.pallas import tpu as pltpu


_MAX_BLOCK_BYTES = 4 * 1024 * 1024       # ~4 MiB blocks: bigger tiles amortize per-step
                                          # overhead; 2x(in+out) buffers ~16 MiB, OK on v7x
_VMEM_LIMIT_BYTES = 48 * 1024 * 1024      # > v5e 16 MiB scoped default, < v7x 64 MiB physical
_DEFAULT_MIN_KERNEL_BYTES = 1 * 1024 * 1024  # below this a copy kernel is ~100% launch overhead


def _copy_kernel(x_ref, o_ref):
    # Identity copy of one lane-dense tile (unmasked vld/vst, HBM-DMA bound).
    o_ref[...] = x_ref[...]


def _sublane_quantum(dtype):
    """Row-rounding quantum: 8 for 32-bit, 16 for bf16, 32 for int8/fp8."""
    itemsize = jnp.dtype(dtype).itemsize
    return 8 * max(1, 4 // max(1, itemsize))


def _pick_slab(total, quantum):
    """Pick (rows, lane) with rows*lane == total and lane a multiple of 128.

    Preference order:
      1. rows is a multiple of the dtype sublane quantum (fully packed vregs),
      2. rows >= quantum (full-extent block, still lane-dense),
      3. any 128-multiple lane (only for tiny/odd payloads).
    """
    lanes = (1024, 512, 2048, 4096, 256, 128, 8192, 16384, 32768)
    for lane in lanes:
        if total % lane == 0 and (total // lane) % quantum == 0:
            return total // lane, lane
    for lane in lanes:
        if total % lane == 0 and (total // lane) >= quantum:
            return total // lane, lane
    for lane in lanes:
        if total % lane == 0:
            return total // lane, lane
    return None, None


def _pick_tile_rows(rows, lane, quantum, itemsize):
    """Largest tile_rows within the block-byte cap, preferring an even divisor of rows."""
    max_rows = max(quantum,
                   (_MAX_BLOCK_BYTES // (lane * itemsize)) // quantum * quantum)
    if rows <= max_rows:
        return rows                       # single full-extent block (always legal)
    # Largest divisor of rows that is a multiple of quantum and <= max_rows
    # -> every tile is full-size, no masked/ragged tail.
    t = (max_rows // quantum) * quantum
    while t >= quantum:
        if rows % t == 0:
            return t
        t -= quantum
    # No even divisor found: fall back to a ragged (masked) last block.
    return (max_rows // quantum) * quantum


def _pallas_identity_copy(flat, min_kernel_bytes=_DEFAULT_MIN_KERNEL_BYTES):
    """Tiled, lane-dense identity copy of a flat 1-D payload via Pallas."""
    total = flat.shape[0]
    itemsize = jnp.dtype(flat.dtype).itemsize
    total_bytes = total * itemsize

    # Small-payload bypass: launching a kernel would be pure overhead.
    if total_bytes < min_kernel_bytes:
        return flat

    quantum = _sublane_quantum(flat.dtype)
    rows, lane = _pick_slab(total, quantum)

    if rows is None:
        # Payload length not a multiple of 128 lanes.
        if total_bytes <= _MAX_BLOCK_BYTES:
            # Single full-extent (1, total) block is legal for any length.
            out = pl.pallas_call(
                _copy_kernel,
                out_shape=jax.ShapeDtypeStruct((1, total), flat.dtype),
                grid=(1,),
                in_specs=[pl.BlockSpec((1, total), lambda i: (0, 0))],
                out_specs=pl.BlockSpec((1, total), lambda i: (0, 0)),
                compiler_params=pltpu.CompilerParams(
                    vmem_limit_bytes=_VMEM_LIMIT_BYTES),
                cost_estimate=pl.CostEstimate(
                    flops=0, transcendentals=0, bytes_accessed=2 * total_bytes),
            )(flat.reshape(1, total))
            return out.reshape(total)
        # TODO(synk): large non-128-divisible payload returned un-copied
        # (values identical; materialized-copy contract not honored here).
        return flat

    tile_rows = _pick_tile_rows(rows, lane, quantum, itemsize)
    slab = flat.reshape(rows, lane)
    out = pl.pallas_call(
        _copy_kernel,
        out_shape=jax.ShapeDtypeStruct((rows, lane), flat.dtype),
        grid=(pl.cdiv(rows, tile_rows),),
        in_specs=[pl.BlockSpec((tile_rows, lane), lambda i: (i, 0))],
        out_specs=pl.BlockSpec((tile_rows, lane), lambda i: (i, 0)),
        compiler_params=pltpu.CompilerParams(
            # "parallel" lets v7x's second TC share the copy; HBM-bound, so at
            # best neutral on v5e/v6e — do not tune further here.
            dimension_semantics=("parallel",),
            vmem_limit_bytes=_VMEM_LIMIT_BYTES,
        ),
        cost_estimate=pl.CostEstimate(
            flops=0, transcendentals=0, bytes_accessed=2 * total_bytes),
    )(slab)
    return out.reshape(total)


def _resolve_shape(feat, shape):
    """Resolve a PyTorch-style target shape (supports a single -1) against feat."""
    shape = tuple(int(s) for s in shape)
    if shape.count(-1) > 1:
        raise ValueError("only one -1 dimension is allowed in shape")
    if -1 in shape:
        known = math.prod(s for s in shape if s != -1)
        assert known > 0 and feat % known == 0, (
            f"cannot infer -1: {feat} not divisible by {known}")
        shape = tuple(feat // known if s == -1 else s for s in shape)
    tgt = math.prod(shape) if shape else 1
    assert tgt == feat, f"cannot view feat={feat} as {shape}"
    return shape


def reshape_forward(x, shape, materialize_copy=False,
                    min_kernel_bytes=_DEFAULT_MIN_KERNEL_BYTES):
    """Pallas/JAX equivalent of Reshape.forward: x.view(x.size(0), *shape).

    Default path is the zero-cost metadata reshape (recommended).
    materialize_copy=True routes the payload through the tiled Pallas
    identity-copy kernel (useful only as a fusion anchor); payloads smaller
    than min_kernel_bytes bypass the kernel since it would be pure overhead.
    """
    b = x.shape[0]
    feat = math.prod(x.shape[1:]) if x.ndim > 1 else 1
    shape = _resolve_shape(feat, shape)

    if not materialize_copy:
        # Metadata-only reshape: zero HBM traffic, zero launch overhead.
        return x.reshape((b,) + shape)

    flat = x.reshape(b * feat)
    flat = _pallas_identity_copy(flat, min_kernel_bytes=min_kernel_bytes)
    return flat.reshape((b,) + shape)


if __name__ == "__main__":
    key = jax.random.PRNGKey(0)
    # Example consistent with typical ganmm usage: NCHW activation reshaped
    # to (B, 16, 64) around a linear stage.
    x = jax.random.normal(key, (2, 4, 16, 16), dtype=jnp.float32)
    target_shape = [16, 64]  # 4*16*16 == 16*64 == 1024

    ref = x.reshape(x.shape[0], *target_shape)

    # 1) Primary (recommended) path: pure metadata reshape, no kernel.
    out_fast = jax.block_until_ready(reshape_forward(x, target_shape))

    # 2) Materialized path forced through the Pallas copy kernel
    #    (min_kernel_bytes=0 overrides the small-payload bypass for this test;
    #    f32 slab resolves to (8, 256): full sublanes, unmasked stores).
    out_copy = jax.block_until_ready(
        reshape_forward(x, target_shape, materialize_copy=True, min_kernel_bytes=0))

    # 3) bf16 payload: exercises the dtype-aware sublane quantum (16-row slab).
    xb = x.astype(jnp.bfloat16)
    out_bf16 = jax.block_until_ready(
        reshape_forward(xb, target_shape, materialize_copy=True, min_kernel_bytes=0))

    # 4) -1 dimension inference (PyTorch .view semantics).
    out_infer = jax.block_until_ready(reshape_forward(x, [-1, 64]))

    assert out_fast.shape == (2, 16, 64), out_fast.shape
    assert out_copy.shape == (2, 16, 64), out_copy.shape
    assert out_bf16.shape == (2, 16, 64), out_bf16.shape
    assert out_infer.shape == (2, 16, 64), out_infer.shape
    assert out_fast.dtype == x.dtype and out_copy.dtype == x.dtype
    assert out_bf16.dtype == jnp.bfloat16
    assert jnp.array_equal(out_fast, ref)
    assert jnp.array_equal(out_copy, ref)
    assert jnp.array_equal(out_bf16, xb.reshape(2, 16, 64))
    assert jnp.array_equal(out_infer, ref)

    print("KERNEL_OK")
</pallas_src>

<mosaic_0001>
module attributes {stable_mosaic.version = 11 : i64} {
  func.func @_copy_kernel(%arg0: i32, %arg1: memref<8x256xf32, #tpu.memory_space<vmem>>, %arg2: memref<8x256xf32, #tpu.memory_space<vmem>>) attributes {dimension_semantics = [#tpu.dimension_semantics<parallel>], iteration_bounds = array<i64: 1>, scalar_prefetch = 0 : i64, scratch_operands = 0 : i64, tpu.core_type = #tpu.core_type<tc>, window_params = [{transform_indices = @transform_0, window_bounds = array<i64: 8, 256>}, {transform_indices = @transform_1, window_bounds = array<i64: 8, 256>}]} {
    %c0 = arith.constant 0 : index
    %c0_0 = arith.constant 0 : index
    %0 = vector.load %arg1[%c0, %c0_0] : memref<8x256xf32, #tpu.memory_space<vmem>>, vector<8x256xf32>
    %c0_1 = arith.constant 0 : index
    %c0_2 = arith.constant 0 : index
    %1 = vector.load %arg2[%c0_1, %c0_2] : memref<8x256xf32, #tpu.memory_space<vmem>>, vector<8x256xf32>
    tpu.vector_store %arg2[%c0_1, %c0_2], %0 {strides = array<i32>} : memref<8x256xf32, #tpu.memory_space<vmem>>, vector<8x256xf32>,
    return
  }
  func.func @transform_0(%arg0: i32) -> (i32, i32) {
    %c0_i32 = arith.constant 0 : i32
    %c0_i32_0 = arith.constant 0 : i32
    return %arg0, %c0_i32 : i32, i32
  }
  func.func @transform_1(%arg0: i32) -> (i32, i32) {
    %c0_i32 = arith.constant 0 : i32
    %c0_i32_0 = arith.constant 0 : i32
    return %arg0, %c0_i32 : i32, i32
  }
}

</mosaic_0001>

<bundles_post_ra>
// kernel: tpu_custom_call.1
= control target key start
LH: loop header
LB: loop body
LE: loop exit
PB: predicated region body
PF: predicated region fallthrough
CT: control target
= control target key end

     0   :  { %6 = vsyncpa [#allocation3], 0  ;;  %s104_s0 = inlined_call_operand.hbm [shape: f32[8,256], index: 0, kind: input, shape index: {}]   ;;  %s105_s1 = inlined_call_operand.hbm [shape: f32[8,256], index: 1, kind: output, shape index: {}]  }
   0x1   :  { %7 = vsyncpa [#allocation4], 0  ;;  %s86_s6 = smov [#allocation2]  }
   0x2   :  { %s14_s7 = sshll.u32 %s86_s6, 4  ;;  %s15_s7 = int_to_ptr.vmem [resolvable:$true] %s14_s7 }
   0x3   :  { %s50_s8 = scalar_lea.vmem %s15_s7, 256  ;;  %p55_p1 = scmp.lt.s32.totalorder %s15_s7, %s15_s7 }
   0x4   :  { %p51_p0 = scmp.ne.s32.totalorder %s15_s7, %s50_s8  ;;  %p56_p2 = scmp.lt.s32.totalorder %s50_s8, %s50_s8 }
   0x6   :  { %p57_p3 = por %p56_p2, %p55_p1 }
   0x8   :  { %p58_p4 = pnand %p57_p3, %p51_p0 }
   0xa   :  { %61 = shalt.err (!%p58_p4)
}
   0xb   :  { %17 = dma.hbm_to_vmem [thread:$0]  %s104_s0, 256, %s15_s7, [#allocation3]  }
   0xc   :  { %82 = dma.done.wait [#allocation3], 256  }
   0xd   :  { %83 = vsyncadd [#allocation3], 4294967040  ;;  %s87_s11 = smov [#allocation5]   ;;  %v21_v0 = vld [vmem:[#allocation2] sm:$0xff]  ;;  %v22_v1 = vld [vmem:[#allocation2 + $0x8] sm:$0xff] }
   0xe   :  { %s31_s12 = sshll.u32 %s87_s11, 4  ;;  %23 = vst [vmem:[#allocation5] sm:$0xff] %v21_v0  ;;  %24 = vst [vmem:[#allocation5 + $0x8] sm:$0xff] %v22_v1  ;;  %s32_s12 = int_to_ptr.vmem [resolvable:$true] %s31_s12 }
   0xf   :  { %s62_s13 = scalar_lea.vmem %s32_s12, 256  ;;  %p67_p6 = scmp.lt.s32.totalorder %s32_s12, %s32_s12 }
  0x10   :  { %p63_p5 = scmp.ne.s32.totalorder %s32_s12, %s62_s13  ;;  %p68_p7 = scmp.lt.s32.totalorder %s62_s13, %s62_s13 }
  0x12   :  { %p69_p8 = por %p68_p7, %p67_p6 }
  0x14   :  { %p70_p9 = pnand %p69_p8, %p63_p5 }
  0x16   :  { %73 = shalt.err (!%p70_p9)
}
  0x17   :  { %34 = dma.vmem_to_hbm [thread:$0]  %s32_s12, 256, %s105_s1, [#allocation4]  }
  0x18   :  { %84 = dma.done.wait [#allocation4], 256  }
  0x19   :  { %85 = vsyncadd [#allocation4], 4294967040 }
  0x1a   :  { %38 = vsyncpa [#allocation3], 1 }
  0x1b   :  { %39 = vsyncpa [#allocation4], 1 }

</bundles_post_ra>
